<compile_context>
chip_gen: v7x
topology: tpu7x:2x2x1
jax: 0.10.0
libtpu: 0.0.40
codegen_flags: <defaults>
</compile_context>

<pallas_src>
import math

import jax
import jax.numpy as jnp
from jax.experimental import pallas as pl
from jax.experimental.pallas import tpu as pltpu


def build_pe_table(embed_dim: int, max_len: int = 5000) -> jnp.ndarray:
    """Replicates the PyTorch __init__ buffer: pe of shape (max_len, embed_dim)."""
    position = jnp.arange(0, max_len, dtype=jnp.float32)[:, None]            # (L, 1)
    divide = jnp.exp(
        jnp.arange(0, embed_dim, 2, dtype=jnp.float32)
        * (-math.log(10000.0) / embed_dim)
    )                                                                         # (D/2,)
    sin = jnp.sin(position * divide)                                          # (L, D/2)
    cos = jnp.cos(position * divide)                                          # (L, D/2)
    pe = jnp.zeros((max_len, embed_dim), dtype=jnp.float32)
    pe = pe.at[:, 0::2].set(sin)
    pe = pe.at[:, 1::2].set(cos)
    return pe


def _pe_add_kernel(x_ref, pe_ref, o_ref):
    # x_ref / o_ref: (bt, ts, D) tile; pe_ref: (ts, D) float32 tile shared across
    # the batch rows of the block. Compute in f32 (PyTorch promotion), cast back.
    x = x_ref[...].astype(jnp.float32)
    o_ref[...] = (x + pe_ref[...][None, :, :]).astype(o_ref.dtype)


def positional_encoding(x: jnp.ndarray, pe_table: jnp.ndarray, *,
                        target_block_bytes: int = 4 * 1024 * 1024,
                        donate_x: bool = False) -> jnp.ndarray:
    """x: (B, S, D); pe_table: (max_len, D) float32 buffer (passed in whole)."""
    B, S, D = x.shape
    max_len, d_pe = pe_table.shape
    assert d_pe == D, "pe_table embed dim must match x"
    assert S <= max_len, "sequence length exceeds max_len of the PE buffer"

    x_item = jnp.dtype(x.dtype).itemsize
    pe_item = jnp.dtype(pe_table.dtype).itemsize
    row_bytes = D * max(x_item, pe_item)

    if S >= 8:
        # Full table goes in; BlockSpec indexing only reads the first S rows.
        pe_in = pe_table
        ts = max(8, (target_block_bytes // row_bytes) // 8 * 8)   # 8-aligned tile
        ts = min(ts, pl.cdiv(S, 8) * 8)   # ragged last tile handled by Pallas masking
    else:
        # Degenerate tiny sequence: one full-extent block (block dims == array dims).
        pe_in = pe_table[:S, :]
        ts = S

    # Fold batch rows into the block when a single (ts, D) slab is below target,
    # so short-S / small-D shapes don't pay per-grid-step overhead.
    bt = max(1, min(B, target_block_bytes // max(1, ts * row_bytes)))

    n_seq = pl.cdiv(S, ts)
    n_bat = pl.cdiv(B, bt)

    # Megacore: shard on the seq-tile axis when there are >= 2 tiles; keep batch
    # as the inner, non-sharded loop so the PE tile DMA is reused across it.
    if n_seq >= 2:
        dim_sem = ("parallel", "arbitrary")
    else:
        dim_sem = ("parallel", "parallel")

    # x + out blocks (x dtype) + pe block (f32), double-buffered, plus headroom.
    block_bytes = 2 * bt * ts * D * x_item + ts * D * pe_item
    vmem_limit = int(min(56 * 1024 * 1024,
                         max(2 * block_bytes + (4 << 20), 16 << 20)))

    cost = pl.CostEstimate(
        flops=B * S * D,                                   # one add per element
        transcendentals=0,
        bytes_accessed=2 * B * S * D * x_item + S * D * pe_item,
    )

    return pl.pallas_call(
        _pe_add_kernel,
        out_shape=jax.ShapeDtypeStruct((B, S, D), x.dtype),
        grid_spec=pltpu.PrefetchScalarGridSpec(
            num_scalar_prefetch=0,
            grid=(n_seq, n_bat),
            in_specs=[
                # x tile: bt batch rows, ts sequence rows, full embed dim.
                pl.BlockSpec((bt, ts, D), lambda s, b: (b, s, 0)),
                # PE tile: index ignores b, so its DMA is skipped across the
                # inner batch loop (PE traffic ~= S*D, not B*S*D).
                pl.BlockSpec((ts, D), lambda s, b: (s, 0)),
            ],
            out_specs=pl.BlockSpec((bt, ts, D), lambda s, b: (b, s, 0)),
        ),
        compiler_params=pltpu.CompilerParams(
            dimension_semantics=dim_sem,
            vmem_limit_bytes=vmem_limit,
        ),
        cost_estimate=cost,
        input_output_aliases=({0: 0} if donate_x else {}),
    )(x, pe_in)


if __name__ == "__main__":
    # Small but representative shapes: lane-dense D (multiple of 128).
    B, S, D = 2, 16, 128
    max_len = 64  # > S; semantics identical to the PyTorch default max_len=5000

    key = jax.random.PRNGKey(0)
    x = jax.random.normal(key, (B, S, D), dtype=jnp.float32)

    pe_table = build_pe_table(D, max_len)

    # Default (single big block) path.
    out = jax.block_until_ready(positional_encoding(x, pe_table))

    # Also exercise the multi-tile path (tiny block budget -> grid (2, 2)).
    out_tiled = jax.block_until_ready(
        positional_encoding(x, pe_table, target_block_bytes=8 * 128 * 4))

    # Reference check (pure JAX), matching the PyTorch forward semantics.
    ref = x + pe_table[None, :S, :]
    assert out.shape == (B, S, D)
    assert jnp.allclose(out, ref, atol=1e-6), "mismatch vs reference (default tiling)"
    assert jnp.allclose(out_tiled, ref, atol=1e-6), "mismatch vs reference (seq-tiled)"

    print("KERNEL_OK")
</pallas_src>

<mosaic_0001>
module attributes {stable_mosaic.version = 11 : i64} {
  func.func @_pe_add_kernel(%arg0: i32, %arg1: i32, %arg2: memref<2x16x128xf32, #tpu.memory_space<vmem>>, %arg3: memref<16x128xf32, #tpu.memory_space<vmem>>, %arg4: memref<2x16x128xf32, #tpu.memory_space<vmem>>) attributes {dimension_semantics = [#tpu.dimension_semantics<parallel>, #tpu.dimension_semantics<parallel>], iteration_bounds = array<i64: 1, 1>, scalar_prefetch = 0 : i64, scratch_operands = 0 : i64, tpu.core_type = #tpu.core_type<tc>, window_params = [{transform_indices = @transform_0, window_bounds = array<i64: 2, 16, 128>}, {transform_indices = @transform_1, window_bounds = array<i64: 16, 128>}, {transform_indices = @transform_2, window_bounds = array<i64: 2, 16, 128>}]} {
    %c0 = arith.constant 0 : index
    %c0_0 = arith.constant 0 : index
    %c0_1 = arith.constant 0 : index
    %0 = vector.load %arg2[%c0, %c0_0, %c0_1] : memref<2x16x128xf32, #tpu.memory_space<vmem>>, vector<2x16x128xf32>
    %c0_2 = arith.constant 0 : index
    %c0_3 = arith.constant 0 : index
    %1 = vector.load %arg3[%c0_2, %c0_3] : memref<16x128xf32, #tpu.memory_space<vmem>>, vector<16x128xf32>
    %2 = vector.shape_cast %1 : vector<16x128xf32> to vector<1x16x128xf32>
    %3 = vector.broadcast %2 : vector<1x16x128xf32> to vector<2x16x128xf32>
    %4 = arith.addf %0, %3 : vector<2x16x128xf32>
    %c0_4 = arith.constant 0 : index
    %c0_5 = arith.constant 0 : index
    %c0_6 = arith.constant 0 : index
    %5 = vector.load %arg4[%c0_4, %c0_5, %c0_6] : memref<2x16x128xf32, #tpu.memory_space<vmem>>, vector<2x16x128xf32>
    tpu.vector_store %arg4[%c0_4, %c0_5, %c0_6], %4 {strides = array<i32>} : memref<2x16x128xf32, #tpu.memory_space<vmem>>, vector<2x16x128xf32>,
    return
  }
  func.func @transform_0(%arg0: i32, %arg1: i32) -> (i32, i32, i32) {
    %c0_i32 = arith.constant 0 : i32
    %c0_i32_0 = arith.constant 0 : i32
    return %arg1, %arg0, %c0_i32 : i32, i32, i32
  }
  func.func @transform_1(%arg0: i32, %arg1: i32) -> (i32, i32) {
    %c0_i32 = arith.constant 0 : i32
    %c0_i32_0 = arith.constant 0 : i32
    return %arg0, %c0_i32 : i32, i32
  }
  func.func @transform_2(%arg0: i32, %arg1: i32) -> (i32, i32, i32) {
    %c0_i32 = arith.constant 0 : i32
    %c0_i32_0 = arith.constant 0 : i32
    return %arg1, %arg0, %c0_i32 : i32, i32, i32
  }
}

</mosaic_0001>

<bundles_post_ra>
// kernel: tpu_custom_call.1
= control target key start
LH: loop header
LB: loop body
LE: loop exit
PB: predicated region body
PF: predicated region fallthrough
CT: control target
= control target key end

     0   :  { %7 = vsyncpa [#allocation3], 0  ;;  %s217_s0 = inlined_call_operand.hbm [shape: f32[2,16,128], index: 0, kind: input, shape index: {}]   ;;  %s218_s1 = inlined_call_operand.hbm [shape: f32[64,128], index: 1, kind: input, shape index: {}]   ;;  %s219_s2 = inlined_call_operand.hbm [shape: f32[2,16,128], index: 2, kind: output, shape index: {}]  }
   0x1   :  { %8 = vsyncpa [#allocation6], 0 }
   0x2   :  { %9 = vsyncpa [#allocation4], 0  ;;  %s149_s9 = smov [#allocation2]   ;;  %s77_s13 = scalar_lea.hbm %s217_s0, 512 }
   0x3   :  { %s15_s10 = sshll.u32 %s149_s9, 4  ;;  %p78_p0 = scmp.ne.s32.totalorder %s217_s0, %s77_s13  ;;  %s16_s10 = int_to_ptr.vmem [resolvable:$true] %s15_s10 }
   0x4   :  { %p81_p1 = scmp.lt.u32.totalorder %s77_s13, %s217_s0 }
   0x6   :  { %p83_p2 = pnand %p81_p1, %p78_p0 }
   0x8   :  { %86 = shalt.err (!%p83_p2)
}
   0x9   :  { %s87_s18 = scalar_lea.vmem %s16_s10, 512  ;;  %p92_p4 = scmp.lt.s32.totalorder %s16_s10, %s16_s10 }
   0xa   :  { %p88_p3 = scmp.ne.s32.totalorder %s16_s10, %s87_s18  ;;  %p93_p5 = scmp.lt.s32.totalorder %s87_s18, %s87_s18 }
   0xc   :  { %p94_p6 = por %p93_p5, %p92_p4 }
   0xe   :  { %p95_p7 = pnand %p94_p6, %p88_p3 }
  0x10   :  { %98 = shalt.err (!%p95_p7)
}
  0x11   :  { %s150_s19 = smov 128   ;;  %s151_s20 = smov 8  }
  0x12   :  { %21 = dma.hbm_to_vmem [thread:$0]  %s217_s0, 512, %s16_s10, [#allocation3], %s150_s19, %s150_s19, %s151_s20  }
  0x13   :  { %s152_s23 = smov [#allocation5]   ;;  %s99_s27 = scalar_lea.hbm %s218_s1, 256 }
  0x14   :  { %s27_s24 = sshll.u32 %s152_s23, 4  ;;  %p100_p8 = scmp.ne.s32.totalorder %s218_s1, %s99_s27  ;;  %s28_s24 = int_to_ptr.vmem [resolvable:$true] %s27_s24 }
  0x15   :  { %s101_s4 = scalar_lea.hbm %s218_s1, 1024  ;;  %p103_p10 = scmp.lt.u32.totalorder %s99_s27, %s218_s1 }
  0x16   :  { %p102_p9 = scmp.lt.u32.totalorder %s101_s4, %s99_s27 }
  0x18   :  { %p104_p11 = por %p103_p10, %p102_p9 }
  0x1a   :  { %p105_p12 = pnand %p104_p11, %p100_p8 }
  0x1c   :  { %108 = shalt.err (!%p105_p12)
}
  0x1d   :  { %s109_s0 = scalar_lea.vmem %s28_s24, 256  ;;  %p114_p0 = scmp.lt.s32.totalorder %s28_s24, %s28_s24 }
  0x1e   :  { %p110_p13 = scmp.ne.s32.totalorder %s28_s24, %s109_s0  ;;  %p115_p1 = scmp.lt.s32.totalorder %s109_s0, %s109_s0 }
  0x20   :  { %p116_p2 = por %p115_p1, %p114_p0 }
  0x22   :  { %p117_p3 = pnand %p116_p2, %p110_p13 }
  0x24   :  { %120 = shalt.err (!%p117_p3)
}
  0x25   :  { %33 = dma.hbm_to_vmem [thread:$0]  %s218_s1, 256, %s28_s24, [#allocation6], %s150_s19, %s150_s19, %s151_s20  }
  0x26   :  { %143 = dma.done.wait [#allocation3], 512  }
  0x27   :  { %144 = vsyncadd [#allocation3], 4294966784 }
  0x28   :  { %145 = dma.done.wait [#allocation6], 256  }
  0x29   :  { %146 = vsyncadd [#allocation6], 4294967040  ;;  %s153_s9 = smov [#allocation7]   ;;  %v40_v0 = vld [vmem:[#allocation2] sm:$0xff]  ;;  %v41_v2 = vld [vmem:[#allocation2 + $0x8] sm:$0xff] }
  0x2a   :  { %s59_s10 = sshll.u32 %s153_s9, 4  ;;  %v44_v1 = vld [vmem:[#allocation5] sm:$0xff]  ;;  %v45_v4 = vld [vmem:[#allocation5 + $0x8] sm:$0xff]  ;;  %v42_v5 = vld [vmem:[#allocation2 + $0x10] sm:$0xff]  ;;  %s60_s10 = int_to_ptr.vmem [resolvable:$true] %s59_s10 }
  0x2b   :  { %v46_v3 = vadd.f32 %v44_v1, %v40_v0  ;;  %v43_v6 = vld [vmem:[#allocation2 + $0x18] sm:$0xff]  ;;  %v47_v7 = vadd.f32 %v45_v4, %v41_v2  ;;  %v48_v8 = vadd.f32 %v44_v1, %v42_v5  ;;  %s121_s1 = scalar_lea.vmem %s60_s10, 512  ;;  %p126_p5 = scmp.lt.s32.totalorder %s60_s10, %s60_s10 }
  0x2c   :  { %v49_v9 = vadd.f32 %v45_v4, %v43_v6  ;;  %p122_p4 = scmp.ne.s32.totalorder %s60_s10, %s121_s1  ;;  %p127_p6 = scmp.lt.s32.totalorder %s121_s1, %s121_s1 }
  0x2d   :  { %50 = vst [vmem:[#allocation7] sm:$0xff] %v46_v3  ;;  %51 = vst [vmem:[#allocation7 + $0x8] sm:$0xff] %v47_v7 }
  0x2e   :  { %52 = vst [vmem:[#allocation7 + $0x10] sm:$0xff] %v48_v8  ;;  %53 = vst [vmem:[#allocation7 + $0x18] sm:$0xff] %v49_v9  ;;  %p128_p7 = por %p127_p6, %p126_p5 }
  0x30   :  { %p129_p8 = pnand %p128_p7, %p122_p4 }
  0x32   :  { %132 = shalt.err (!%p129_p8)
}
  0x33   :  { %s133_s13 = scalar_lea.hbm %s219_s2, 512 }
  0x34   :  { %p134_p9 = scmp.ne.s32.totalorder %s219_s2, %s133_s13  ;;  %p137_p10 = scmp.lt.u32.totalorder %s133_s13, %s219_s2 }
  0x36   :  { %p139_p11 = pnand %p137_p10, %p134_p9 }
  0x38   :  { %142 = shalt.err (!%p139_p11)
}
  0x39   :  { %65 = dma.vmem_to_hbm [thread:$0]  %s60_s10, 512, %s219_s2, [#allocation4], %s150_s19, %s150_s19, %s151_s20  }
  0x3a   :  { %147 = dma.done.wait [#allocation4], 512  }
  0x3b   :  { %148 = vsyncadd [#allocation4], 4294966784 }
  0x3c   :  { %69 = vsyncpa [#allocation3], 1 }
  0x3d   :  { %70 = vsyncpa [#allocation6], 1 }
  0x3e   :  { %71 = vsyncpa [#allocation4], 1 }

</bundles_post_ra>
